<compile_context>
chip_gen: v7x
topology: tpu7x:2x2x1
jax: 0.10.0
libtpu: 0.0.40
codegen_flags: <defaults>
</compile_context>

<pallas_src>
import jax
import jax.numpy as jnp
from jax.experimental import pallas as pl
from jax.experimental.pallas import tpu as pltpu

EPS = 1e-5  # torch.nn.BatchNorm2d default eps


def bn_tanh_kernel(x_ref, gamma_ref, beta_ref, o_ref):
    # x_ref / o_ref: (N, tc, HW) block; gamma_ref / beta_ref: (C, 1), VMEM-resident.
    x = x_ref[...].astype(jnp.float32)
    n, tc, hw = x.shape
    inv_m = 1.0 / float(n * hw)

    # Single traversal for both statistics.
    s = jnp.sum(x, axis=(0, 2), keepdims=True)          # (1, tc, 1)
    sq = jnp.sum(x * x, axis=(0, 2), keepdims=True)     # (1, tc, 1)
    mean = s * inv_m
    var = jnp.maximum(sq * inv_m - mean * mean, 0.0)    # biased var, clamp cancellation
    inv_std = jax.lax.rsqrt(var + EPS)

    # Slice this step's channels out of the resident per-channel parameters.
    c_start = pl.program_id(0) * tc
    if tc % 8 == 0:
        c_start = pl.multiple_of(c_start, 8)
    g = gamma_ref[pl.ds(c_start, tc), :].astype(jnp.float32).reshape(1, tc, 1)
    b = beta_ref[pl.ds(c_start, tc), :].astype(jnp.float32).reshape(1, tc, 1)

    scale = inv_std * g
    shift = b - mean * scale
    o_ref[...] = jnp.tanh(x * scale + shift).astype(o_ref.dtype)


def bn_layer2(x0, x1, gamma, beta, vmem_budget_bytes=32 << 20):
    """Forward of BNLayer2.

    x0: (b0, b1, c0, c1, h, w) -> training-mode BatchNorm2d over C = c0*c1
        channels followed by tanh. x1 is passed through unchanged.
    gamma/beta: per-channel affine params, shape (C,) or (C, 1).
    """
    b0, b1, c0, c1, h, w = x0.shape
    N, C, HW = b0 * b1, c0 * c1, h * w

    # Contiguous reshape only (no HBM transpose passes): channels stay on the
    # sublane axis, spatial dims are lane-dense, batch is the leading dim.
    x3d = x0.reshape(N, C, HW)
    gamma = gamma.reshape(C, 1).astype(jnp.float32)
    beta = beta.reshape(C, 1).astype(jnp.float32)

    itemsize = jnp.dtype(x0.dtype).itemsize
    min_sub = 8 * max(1, 4 // itemsize)        # min sublane tile: 8 (f32), 16 (bf16)

    # The pipeline double-buffers both the input and the output block:
    # per-step VMEM ~= 2 * 2 * N * tc * HW * itemsize bytes.
    per_chan_bytes = 4 * N * HW * itemsize
    cap = max(1, vmem_budget_bytes // per_chan_bytes)

    # Largest multiple-of-min_sub divisor of C that fits the budget and keeps
    # >= 2 grid steps (feeds both TensorCores on v7x). Fallback: one full-C
    # block (the full-dim exception lifts the sublane-divisibility rule).
    divisors = [t for t in range(min_sub, C, min_sub) if C % t == 0 and t <= cap]
    tc = max(divisors) if divisors else C
    # TODO(synk): if even the minimum channel tile exceeds VMEM (huge N*h*w),
    # add a second "arbitrary" grid axis over the reduction dim with running
    # sum / sum-of-squares accumulators (init/finalize via pl.when).

    grid = (C // tc,)
    vmem_limit = int(min(max(4 * N * tc * HW * itemsize + (4 << 20), 16 << 20), 48 << 20))

    out3d = pl.pallas_call(
        bn_tanh_kernel,
        out_shape=jax.ShapeDtypeStruct((N, C, HW), x0.dtype),
        grid=grid,
        in_specs=[
            pl.BlockSpec((N, tc, HW), lambda i: (0, i, 0)),
            pl.BlockSpec((C, 1), lambda i: (0, 0)),   # resident, fetched once
            pl.BlockSpec((C, 1), lambda i: (0, 0)),   # resident, fetched once
        ],
        out_specs=pl.BlockSpec((N, tc, HW), lambda i: (0, i, 0)),
        compiler_params=pltpu.CompilerParams(
            dimension_semantics=("parallel",),
            vmem_limit_bytes=vmem_limit,
        ),
    )(x3d, gamma, beta)

    xx = out3d.reshape(x0.shape)  # contiguous reshape, free
    yy = x1                       # .contiguous() is a layout no-op in JAX
    return xx, yy


def _reference(x0, gamma, beta):
    b0, b1, c0, c1, h, w = x0.shape
    x4 = x0.reshape(b0 * b1, c0 * c1, h, w).astype(jnp.float32)
    mean = jnp.mean(x4, axis=(0, 2, 3), keepdims=True)
    var = jnp.mean((x4 - mean) ** 2, axis=(0, 2, 3), keepdims=True)
    g = gamma.reshape(1, -1, 1, 1)
    b = beta.reshape(1, -1, 1, 1)
    y = (x4 - mean) / jnp.sqrt(var + EPS) * g + b
    return jnp.tanh(y).reshape(x0.shape).astype(x0.dtype)


if __name__ == "__main__":
    key = jax.random.PRNGKey(0)
    k0, k1 = jax.random.split(key)

    # x0: (b0, b1, c0, c1, h, w)  ->  BN over c0*c1 = 16 channels, N*h*w = 512 each
    x0 = jax.random.normal(k0, (2, 2, 4, 4, 8, 16), dtype=jnp.float32)
    x1 = jax.random.normal(k1, (2, 2, 4, 4), dtype=jnp.float32)

    C = x0.shape[2] * x0.shape[3]
    # Deterministic fresh BatchNorm2d parameters: weight=1, bias=0.
    gamma = jnp.ones((C,), dtype=jnp.float32)
    beta = jnp.zeros((C,), dtype=jnp.float32)
    # TODO(synk): running_mean / running_var buffer updates of training-mode BN
    # are not reproduced (they do not affect the forward output here).

    xx, yy = bn_layer2(x0, x1, gamma, beta)
    jax.block_until_ready((xx, yy))

    ref = _reference(x0, gamma, beta)
    assert xx.shape == x0.shape and yy.shape == x1.shape
    assert jnp.allclose(xx, ref, atol=3e-5, rtol=3e-5)
    assert jnp.array_equal(yy, x1)

    print("KERNEL_OK")
</pallas_src>

<mosaic_0001>
module attributes {stable_mosaic.version = 11 : i64} {
  func.func @bn_tanh_kernel(%arg0: i32, %arg1: memref<4x8x128xf32, #tpu.memory_space<vmem>>, %arg2: memref<16x1xf32, #tpu.memory_space<vmem>>, %arg3: memref<16x1xf32, #tpu.memory_space<vmem>>, %arg4: memref<4x8x128xf32, #tpu.memory_space<vmem>>) attributes {dimension_semantics = [#tpu.dimension_semantics<parallel>], iteration_bounds = array<i64: 2>, scalar_prefetch = 0 : i64, scratch_operands = 0 : i64, tpu.core_type = #tpu.core_type<tc>, window_params = [{transform_indices = @transform_0, window_bounds = array<i64: 4, 8, 128>}, {pipeline_mode = #tpu.pipeline_mode<synchronous>, transform_indices = @transform_1, window_bounds = array<i64: 16, 1>}, {pipeline_mode = #tpu.pipeline_mode<synchronous>, transform_indices = @transform_2, window_bounds = array<i64: 16, 1>}, {transform_indices = @transform_3, window_bounds = array<i64: 4, 8, 128>}]} {
    %c0 = arith.constant 0 : index
    %c0_0 = arith.constant 0 : index
    %c0_1 = arith.constant 0 : index
    %0 = vector.load %arg1[%c0, %c0_0, %c0_1] : memref<4x8x128xf32, #tpu.memory_space<vmem>>, vector<4x8x128xf32>
    %cst = arith.constant dense<0.000000e+00> : vector<8xf32>
    %1 = vector.multi_reduction <add>, %0, %cst [0, 2] : vector<4x8x128xf32> to vector<8xf32>
    %2 = vector.shape_cast %1 : vector<8xf32> to vector<1x8x1xf32>
    %3 = arith.mulf %0, %0 : vector<4x8x128xf32>
    %cst_2 = arith.constant dense<0.000000e+00> : vector<8xf32>
    %4 = vector.multi_reduction <add>, %3, %cst_2 [0, 2] : vector<4x8x128xf32> to vector<8xf32>
    %5 = vector.shape_cast %4 : vector<8xf32> to vector<1x8x1xf32>
    %cst_3 = arith.constant 0.001953125 : f32
    %6 = vector.broadcast %cst_3 : f32 to vector<1x8x1xf32>
    %7 = arith.mulf %2, %6 : vector<1x8x1xf32>
    %cst_4 = arith.constant 0.001953125 : f32
    %8 = vector.broadcast %cst_4 : f32 to vector<1x8x1xf32>
    %9 = arith.mulf %5, %8 : vector<1x8x1xf32>
    %10 = arith.mulf %7, %7 : vector<1x8x1xf32>
    %11 = arith.subf %9, %10 : vector<1x8x1xf32>
    %cst_5 = arith.constant 0.000000e+00 : f32
    %12 = vector.broadcast %cst_5 : f32 to vector<1x8x1xf32>
    %13 = arith.maximumf %11, %12 : vector<1x8x1xf32>
    %cst_6 = arith.constant 9.99999974E-6 : f32
    %14 = vector.broadcast %cst_6 : f32 to vector<1x8x1xf32>
    %15 = arith.addf %13, %14 : vector<1x8x1xf32>
    %16 = math.rsqrt %15 : vector<1x8x1xf32>
    %c8_i32 = arith.constant 8 : i32
    %17 = arith.muli %arg0, %c8_i32 : i32
    %18 = tpu.assume_multiple %17, 8 : i32
    %19 = arith.index_cast %18 : i32 to index
    %c0_7 = arith.constant 0 : index
    %20 = vector.load %arg2[%19, %c0_7] : memref<16x1xf32, #tpu.memory_space<vmem>>, vector<8x1xf32>
    %21 = vector.shape_cast %20 : vector<8x1xf32> to vector<1x8x1xf32>
    %22 = arith.index_cast %18 : i32 to index
    %c0_8 = arith.constant 0 : index
    %23 = vector.load %arg3[%22, %c0_8] : memref<16x1xf32, #tpu.memory_space<vmem>>, vector<8x1xf32>
    %24 = vector.shape_cast %23 : vector<8x1xf32> to vector<1x8x1xf32>
    %25 = arith.mulf %16, %21 : vector<1x8x1xf32>
    %26 = arith.mulf %7, %25 : vector<1x8x1xf32>
    %27 = arith.subf %24, %26 : vector<1x8x1xf32>
    %28 = vector.broadcast %25 : vector<1x8x1xf32> to vector<4x8x128xf32>
    %29 = arith.mulf %0, %28 : vector<4x8x128xf32>
    %30 = vector.broadcast %27 : vector<1x8x1xf32> to vector<4x8x128xf32>
    %31 = arith.addf %29, %30 : vector<4x8x128xf32>
    %32 = math.tanh %31 : vector<4x8x128xf32>
    %c0_9 = arith.constant 0 : index
    %c0_10 = arith.constant 0 : index
    %c0_11 = arith.constant 0 : index
    %33 = vector.load %arg4[%c0_9, %c0_10, %c0_11] : memref<4x8x128xf32, #tpu.memory_space<vmem>>, vector<4x8x128xf32>
    tpu.vector_store %arg4[%c0_9, %c0_10, %c0_11], %32 {strides = array<i32>} : memref<4x8x128xf32, #tpu.memory_space<vmem>>, vector<4x8x128xf32>,
    return
  }
  func.func @transform_0(%arg0: i32) -> (i32, i32, i32) {
    %c0_i32 = arith.constant 0 : i32
    %c0_i32_0 = arith.constant 0 : i32
    %c0_i32_1 = arith.constant 0 : i32
    return %c0_i32, %arg0, %c0_i32_0 : i32, i32, i32
  }
  func.func @transform_1(%arg0: i32) -> (i32, i32) {
    %c0_i32 = arith.constant 0 : i32
    %c0_i32_0 = arith.constant 0 : i32
    %c0_i32_1 = arith.constant 0 : i32
    return %c0_i32, %c0_i32_0 : i32, i32
  }
  func.func @transform_2(%arg0: i32) -> (i32, i32) {
    %c0_i32 = arith.constant 0 : i32
    %c0_i32_0 = arith.constant 0 : i32
    %c0_i32_1 = arith.constant 0 : i32
    return %c0_i32, %c0_i32_0 : i32, i32
  }
  func.func @transform_3(%arg0: i32) -> (i32, i32, i32) {
    %c0_i32 = arith.constant 0 : i32
    %c0_i32_0 = arith.constant 0 : i32
    %c0_i32_1 = arith.constant 0 : i32
    return %c0_i32, %arg0, %c0_i32_0 : i32, i32, i32
  }
}

</mosaic_0001>

<bundles_post_ra>
// kernel: tpu_custom_call.1
= control target key start
LH: loop header
LB: loop body
LE: loop exit
PB: predicated region body
PF: predicated region fallthrough
CT: control target
= control target key end

     0   :  { %8 = vsyncpa [#allocation3], 0  ;;  %s717_s0 = inlined_call_operand.hbm [shape: f32[4,16,128], index: 0, kind: input, shape index: {}]   ;;  %s718_s1 = inlined_call_operand.vmem [shape: f32[16,1], index: 1, kind: input, shape index: {}]   ;;  %s719_s2 = inlined_call_operand.vmem [shape: f32[16,1], index: 2, kind: input, shape index: {}]   ;;  %s720_s3 = inlined_call_operand.hbm [shape: f32[4,16,128], index: 3, kind: output, shape index: {}]  }
   0x1   :  { %10 = vsyncpa [#allocation3 + $0x1], 0 }
   0x2   :  { %11 = vsyncpa [#allocation4], 0 }
   0x3   :  { %13 = vsyncpa [#allocation4 + $0x1], 0  ;;  %s542_s12 = smov 0   ;;  %s544_s13 = smov 0  }
   0x4   :  { %s546_s14 = smov 0   ;;  %s548_s15 = smov 0  }
   0x5 LB: > { %s563_s16 = sadd.s32 4294967295, %s511_s15   ;;  %s337_s17 = sadd.s32 4294967294, %s511_s15   ;;  %s511_s15 = sphi %s548_s15, %s734_s15   ;;  %s507_s14 = sphi %s546_s14, %s733_s14   ;;  %s503_s13 = sphi %s544_s13, %s732_s13   ;;  %s499_s12 = sphi %s542_s12, %s731_s12  }
   0x6   : > { %s567_s18 = sadd.s32 1, %s511_s15   ;;  %s26_s19 = sadd.s32 1, %s507_s14 }
   0x7   : > { %s23_s20 = ssub.s32 %s511_s15, %s567_s18  ;;  %p33_p0 = scmp.ne.s32.totalorder %s507_s14, %s503_s13 }
   0x8   : > { %p24_p1 = scmp.eq.s32.totalorder %s23_s20, 0  ;;  %p34_p2 = scmp.eq.s32.totalorder %s511_s15, 0 }
   0x9   : > { %p39_p3 = scmp.ne.s32.totalorder %s503_s13, %s499_s12  ;;  %p40_p4 = scmp.eq.s32.totalorder %s563_s16, 0 }
   0xa   : > { %s579_s21 = scalar_select %p24_p1, %s507_s14, %s26_s19  }
   0xb   : > { %p581_p5 = por %p34_p2, %p33_p0  ;;  %p585_p6 = por %p40_p4, %p39_p3 }
   0xc   : > { %p105_p7 = scmp.eq.s32.totalorder %s563_s16, 1  ;;  %p111_p8 = scmp.eq.s32.totalorder %s337_s17, 1 }
   0xd   : > { %p362_p10 = scmp.lt.s32.totalorder %s511_s15, 2  ;;  %s137_s26 = sand.u32 1, %s507_s14  }
   0xe   : > { %p592_p11 = por %p105_p7, %p33_p0  ;;  %p596_p12 = por %p111_p8, %p39_p3 }
   0xf   : > { %s341_s27 = sshll.u32 %s511_s15, 7  ;;  %s340_s28 = sshll.u32 %s137_s26, 5 }
  0x10   : > { %s724_s24 = scalar_select %p592_p11, 1, 0 }
  0x11   : > { %s725_s25 = scalar_select %p596_p12, 1, 0 }
  0x12   : > { %s605_s4 = scalar_lea.hbm %s717_s0, %s341_s27  ;;  %s141_s5 = scalar_lea.vmem [#allocation2], %s340_s28 }
  0x13   : > { %s147_s6 = sshll.u32 %s141_s5, 4  ;;  %p609_p13 = pnand %p362_p10, %p581_p5  ;;  %s613_s6 = int_to_ptr.vmem [resolvable:$true] %s147_s6 }
  0x14   : > { %s616_s8 = scalar_lea.sflag [#allocation3], %s137_s26  ;;  %s415_s9 = scalar_lea.hbm %s605_s4, 512 }
  0x15   : > { %p416_p1 = scmp.ne.s32.totalorder %s605_s4, %s415_s9  ;;  %p417_p2 = pneg %p609_p13 }
  0x16   : > { %s420_s17 = scalar_lea.hbm %s717_s0, 1024  ;;  %p421_p5 = scmp.lt.u32.totalorder %s605_s4, %s717_s0 }
  0x17   : > { %p418_p3 = pnand %p417_p2, %p416_p1  ;;  %p422_p7 = scmp.lt.u32.totalorder %s420_s17, %s415_s9 }
  0x18   : > { %p424_p10 = scmp.lt.u32.totalorder %s415_s9, %s605_s4 }
  0x19   : > { %p419_p4 = pneg %p418_p3  ;;  %p423_p8 = por %p422_p7, %p421_p5 }
  0x1b   : > { %p425_p9 = por %p424_p10, %p423_p8 }
  0x1d   : > { %p426_p0 = pnand %p425_p9, %p419_p4 }
  0x1f   : > { %429 = shalt.err (!%p426_p0)
}
  0x20   : > { %s430_s22 = scalar_lea.vmem %s613_s6, 512  ;;  %s513_s26 = smov [#allocation2]  }
  0x21   : > { %p431_p1 = scmp.ne.s32.totalorder %s613_s6, %s430_s22  ;;  %s435_s27 = sshll.u32 %s513_s26, 4  ;;  %s436_s27 = int_to_ptr.vmem [resolvable:$false] %s435_s27 }
  0x22   : > { %s437_s28 = scalar_lea.vmem %s436_s27, 1024  ;;  %p438_p11 = scmp.lt.s32.totalorder %s613_s6, %s436_s27 }
  0x23   : > { %p433_p3 = pnand %p431_p1, %p417_p2  ;;  %p439_p5 = scmp.lt.s32.totalorder %s437_s28, %s430_s22 }
  0x25   : > { %p434_p12 = pneg %p433_p3  ;;  %p440_p7 = por %p439_p5, %p438_p11 }
  0x27   : > { %p441_p8 = pnand %p440_p7, %p434_p12 }
  0x29   : > { %444 = shalt.err (!%p441_p8)
}
  0x2a   : > { %s514_s29 = smov 256   ;;  %s515_s30 = smov 128  }
  0x2b   : > { %s516_s5 = smov 8   ;;  %p155_p9 = scmp.lt.s32.totalorder %s511_s15, 3 }
  0x2c   : > { %357 = dma.hbm_to_vmem [thread:$0]  (!%p609_p13), %s605_s4, 512, %s613_s6, %s616_s8, %s514_s29, %s515_s30, %s516_s5  }
  0x2d   : > { %p727_p0 = scmp.ge.s32.totalorder %s511_s15, 1 }
  0x2f   : > { %p156_p2 = pnand %p727_p0, %p155_p9 }
  0x30   : > { %s648_s9 = sand.u32 (!%p156_p2), 1, %s503_s13  }
  0x31   : > { %159 = sbr.rel (%p156_p2) target bundleno = 395 (0x18b), region = 32  ;;  %s343_s10 = sshll.u32 (!%p156_p2), %s648_s9, 5 }
  0x32   : > { %s162_s11 = scalar_lea.sflag (!%p156_p2), [#allocation3], %s648_s9  ;;  %s165_s17 = scalar_lea.vmem (!%p156_p2), [#allocation2], %s343_s10 }
  0x38   : > { %490 = dma.done.wait (%p585_p6), %s162_s11, 512  }
  0x39   : > { %492 = vsyncadd (%p585_p6), %s162_s11, 4294966784  ;;  %v188_v0 = vld [vmem:[%s165_s17] sm:$0xff]  ;;  %v189_v1 = vld [vmem:[%s165_s17 + $0x8] sm:$0xff]  ;;  %v517_v14 = vmov 0   ;;  %s345_s23 = sshll.u32 %s563_s16, 3  ;;  %s347_s22 = sshll.u32 %s563_s16, 7 }
  0x3a   : > { %v190_v2 = vld [vmem:[%s165_s17 + $0x10] sm:$0xff]  ;;  %v192_v3 = vadd.f32 %v189_v1, %v188_v0  ;;  %v197_v4 = vmul.f32 %v188_v0, %v188_v0  ;;  %v198_v5 = vmul.f32 %v189_v1, %v189_v1  ;;  %v191_v7 = vld [vmem:[%s165_s17 + $0x18] sm:$0xff]  ;;  %403 = vset.pattern.permute.xlu1 %v517_v14  ;;  %404 = vset.pattern.permute.xlu0 %v517_v14  ;;  %s214_s7 = scalar_lea.vmem %s718_s1, %s345_s23  ;;  %s216_s20 = scalar_lea.vmem %s719_s2, %s345_s23 }
  0x3b   : > { %v199_v6 = vmul.f32 %v190_v2, %v190_v2  ;;  %v200_v9 = vmul.f32 %v191_v7, %v191_v7  ;;  %v215_v23 = vld [vmem:[%s214_s7] sm:$0xff]  ;;  %s187_s26 = scalar_lea.vmem [#allocation5], %s343_s10  ;;  %s671_s30 = scalar_lea.hbm %s720_s3, %s347_s22 }
  0x3c   : > { %v193_v8 = vadd.f32 %v192_v3, %v190_v2  ;;  %v201_v10 = vadd.f32 %v198_v5, %v197_v4  ;;  %v217_v26 = vld [vmem:[%s216_s20] sm:$0xff]  ;;  %s260_s27 = sshll.u32 %s187_s26, 4  ;;  %s248_s16 = scalar_lea.sflag [#allocation4], %s648_s9  ;;  %s673_s27 = int_to_ptr.vmem [resolvable:$true] %s260_s27 }
  0x3d   : > { %s445_s5 = scalar_lea.vmem %s673_s27, 512  ;;  %p728_p11 = scmp.ne.s32.totalorder %s724_s24, 0 }
  0x3e   : > { %v194_v11 = vadd.f32 %v193_v8, %v191_v7  ;;  %v202_v12 = vadd.f32 %v201_v10, %v199_v6  ;;  %p446_p6 = scmp.ne.s32.totalorder %s673_s27, %s445_s5  ;;  %s518_s10 = smov [#allocation5]  }
  0x3f   : > { %s449_s11 = sshll.u32 %s518_s10, 4  ;;  %s450_s11 = int_to_ptr.vmem [resolvable:$false] %s449_s11 }
  0x40   : > { %195 = vadd.xlane.f32.xlu0 %v194_v11  ;;  %v203_v13 = vadd.f32 %v202_v12, %v200_v9  ;;  %p447_p12 = pnand %p446_p6, %p728_p11  ;;  %s451_s17 = scalar_lea.vmem %s450_s11, 1024 }
  0x41   : > { %p452_p4 = scmp.lt.s32.totalorder %s673_s27, %s450_s11  ;;  %p453_p10 = scmp.lt.s32.totalorder %s451_s17, %s445_s5 }
  0x42   : > { %p448_p13 = pneg %p447_p12 }
  0x43   : > { %p454_p1 = por %p453_p10, %p452_p4 }
  0x44   : > { %204 = vadd.xlane.f32.xlu0 %v203_v13 }
  0x45   : > { %p455_p3 = pnand %p454_p1, %p448_p13 }
  0xcd   : > { %v196_v15 = vpop.xlane.xlu0 %195 }
  0xce   : > { %v206_v16 = vmul.f32 0.001953125, %v196_v15 }
  0xd0   : > { %v208_v18 = vmul.f32 %v206_v16, %v206_v16 }
  0xd1   : > { %v205_v17 = vpop.xlane.xlu0 %204 }
  0xd2   : > { %v207_v19 = vmul.f32 0.001953125, %v205_v17 }
  0xd4   : > { %v209_v20 = vsub.f32 %v207_v19, %v208_v18 }
  0xd6   : > { %v210_v21 = vmax.f32 %v209_v20, 0.0 }
  0xd8   : > { %v211_v22 = vadd.f32 1e-05, %v210_v21 }
  0xda   : > { %405 = vrsqrt.f32 %v211_v22 }
  0xe4   : > { %v406_v24 = vpop.eup %405 }
  0xe5   : > { %v218_v25 = vmul.f32 %v406_v24, %v215_v23 }
  0xe7   : > { %223 = vperm.xlu1 %403, %v218_v25   ;;  %v219_v27 = vmul.f32 %v218_v25, %v206_v16 }
  0xe9   : > { %v220_v28 = vsub.f32 %v217_v26, %v219_v27 }
  0xeb   : > { %232 = vperm.xlu1 %403, %v220_v28  }
 0x166   : > { %v224_v29 = vpop.permute.xlu1 %223 }
 0x167   : > { %v226_v30 = vmul.f32 %v224_v29, %v188_v0  ;;  %v227_v31 = vmul.f32 %v224_v29, %v189_v1  ;;  %v228_v32 = vmul.f32 %v224_v29, %v190_v2  ;;  %v229_v33 = vmul.f32 %v224_v29, %v191_v7 }
 0x16a   : > { %v233_v34 = vpop.permute.xlu1 %232 }
 0x16b   : > { %v235_v35 = vadd.f32 %v233_v34, %v226_v30  ;;  %v236_v36 = vadd.f32 %v233_v34, %v227_v31  ;;  %v237_v37 = vadd.f32 %v233_v34, %v228_v32  ;;  %v238_v38 = vadd.f32 %v233_v34, %v229_v33 }
 0x16d   : > { %407 = vtanh.f32 %v235_v35 }
 0x16e   : > { %409 = vtanh.f32 %v236_v36 }
 0x16f   : > { %411 = vtanh.f32 %v237_v37 }
 0x170   : > { %413 = vtanh.f32 %v238_v38 }
 0x177   : > { %v408_v39 = vpop.eup %407 }
 0x178   : > { %v410_v40 = vpop.eup %409  ;;  %243 = vst [vmem:[%s187_s26] sm:$0xff] %v408_v39 }
 0x179   : > { %v412_v41 = vpop.eup %411  ;;  %244 = vst [vmem:[%s187_s26 + $0x8] sm:$0xff] %v410_v40 }
 0x17a   : > { %v414_v42 = vpop.eup %413  ;;  %245 = vst [vmem:[%s187_s26 + $0x10] sm:$0xff] %v412_v41 }
 0x17b   : > { %246 = vst [vmem:[%s187_s26 + $0x18] sm:$0xff] %v414_v42 }
 0x17c   : > { %458 = shalt.err (!%p455_p3)
}
 0x17d   : > { %s459_s23 = scalar_lea.hbm %s671_s30, 512  ;;  %s463_s7 = scalar_lea.hbm %s720_s3, 1024 }
 0x17e   : > { %p460_p5 = scmp.ne.s32.totalorder %s671_s30, %s459_s23  ;;  %p464_p9 = scmp.lt.u32.totalorder %s671_s30, %s720_s3 }
 0x17f   : > { %p465_p0 = scmp.lt.u32.totalorder %s463_s7, %s459_s23  ;;  %p467_p6 = scmp.lt.u32.totalorder %s459_s23, %s671_s30 }
 0x180   : > { %p461_p7 = pnand %p460_p5, %p728_p11 }
 0x181   : > { %p466_p2 = por %p465_p0, %p464_p9 }
 0x182   : > { %p462_p8 = pneg %p461_p7 }
 0x183   : > { %p468_p12 = por %p467_p6, %p466_p2 }
 0x185   : > { %p469_p13 = pnand %p468_p12, %p462_p8 }
 0x187   : > { %472 = shalt.err (!%p469_p13)
}
 0x188   : > { %s519_s20 = smov 128   ;;  %s520_s22 = smov 256  }
 0x189   : > { %s521_s26 = smov 8  }
 0x18a   : > { %352 = dma.vmem_to_hbm [thread:$0]  (%p728_p11), %s673_s27, 512, %s671_s30, %s248_s16, %s519_s20, %s520_s22, %s521_s26  }
 0x18b PF: > { %s275_s28 = sand.u32 1, %s499_s12   ;;  %p729_p4 = scmp.ne.s32.totalorder %s725_s25, 0 }
 0x18c   : > { %p730_p10 = scmp.ge.s32.totalorder %s511_s15, 2  ;;  %s276_s29 = scalar_lea.sflag [#allocation4], %s275_s28 }
 0x18e   : > { %p359_p1 = pnand %p730_p10, %p729_p4 }
 0x190   : > { %494 = dma.done.wait (!%p359_p1), %s276_s29, 512  }
 0x191   : > { %496 = vsyncadd (!%p359_p1), %s276_s29, 4294966784  ;;  %p16_p3 = scmp.ge.s32.totalorder %s567_s18, 4   ;;  %s731_s12 = smov %s503_s13 }
 0x192   : > { %s732_s13 = smov %s507_s14  ;;  %s733_s14 = smov %s579_s21 }
 0x193   : > { %s734_s15 = smov %s567_s18  ;;  %18 = sbr.rel (!%p16_p3) target bundleno = 5 (0x5), region = 79 }
 0x19a   :  { %281 = vsyncpa [#allocation3], 1 }
 0x19b   :  { %283 = vsyncpa [#allocation3 + $0x1], 1 }
 0x19c   :  { %284 = vsyncpa [#allocation4], 1 }
 0x19d   :  { %286 = vsyncpa [#allocation4 + $0x1], 1 }

</bundles_post_ra>
